<compile_context>
chip_gen: v7x
topology: tpu7x:2x2x1
jax: 0.10.0
libtpu: 0.0.40
codegen_flags: <defaults>
</compile_context>

<pallas_src>
import functools

import jax
import jax.numpy as jnp
import numpy as np
from jax.experimental import pallas as pl
from jax.experimental.pallas import tpu as pltpu


def _attention_kernel(x_ref, w_ref, proj_ref, out_ref, ext_ref, *,
                      attention_width, passthrough_all):
    TS, B, H = x_ref.shape
    aw = attention_width

    if passthrough_all:
        # S <= attention_width: every position is a pass-through.
        out_ref[...] = x_ref[...]
        return

    t = pl.program_id(0)

    # Tile 0 has no previous tile: zero the halo region of the scratch.  (Its
    # values only feed output rows < aw, which are overwritten by pass-through.)
    @pl.when(t == 0)
    def _init_halo():
        ext_ref[pl.ds(0, aw)] = jnp.zeros((aw, B, H), jnp.float32)

    x = x_ref[...].astype(jnp.float32)                    # (TS, B, H) one slab load
    w = w_ref[...].astype(jnp.float32)                    # (H, H)
    proj_b = proj_ref[...].astype(jnp.float32).reshape(1, 1, H)

    # ---- per-position attention weights, all timesteps of the tile fused ----
    # u = tanh(x @ W): one (TS*B, H) x (H, H) MXU matmul instead of TS tiny ones.
    u = jnp.tanh(
        jnp.dot(x.reshape(TS * B, H), w, preferred_element_type=jnp.float32)
    ).reshape(TS, B, H)
    # score = u @ proj done as VPU multiply + lane reduction (no N=1 MXU pass).
    score = jnp.sum(u * proj_b, axis=-1, keepdims=True)   # (TS, B, 1)
    # nn.Softmax() implicit dim=1 on the (window, batch) matrix -> softmax over BATCH.
    m = jnp.max(score, axis=1, keepdims=True)
    e = jnp.exp(score - m)
    wts = e / jnp.sum(e, axis=1, keepdims=True)           # (TS, B, 1)

    wx = wts * x                                          # (TS, B, H)

    # ---- vectorized sliding-window sum via the halo scratch ----
    # ext_ref rows [0, aw)      : wx of the previous tile's last `aw` positions
    # ext_ref rows [aw, aw+TS)  : wx of this tile's positions
    ext_ref[pl.ds(aw, TS)] = wx
    win = ext_ref[pl.ds(0, TS)]
    for d in range(1, aw):                                # aw-1 full-tile adds
        win = win + ext_ref[pl.ds(d, TS)]
    # Save this tile's tail as the next tile's halo (grid runs sequentially).
    ext_ref[pl.ds(0, aw)] = wx[TS - aw:]

    out_ref[...] = win.astype(out_ref.dtype)

    # Positions i < attention_width pass through unchanged; they all live in
    # tile 0 because TS >= attention_width + 1.
    @pl.when(t == 0)
    def _prefix():
        out_ref[pl.ds(0, aw)] = x[:aw].astype(out_ref.dtype)


def attention_layer(inputs, weight_W, weight_proj, attention_width=3, seq_tile=256):
    """Windowed attention over (S, B, H) inputs, matching AttentionLayer_bkp.forward."""
    S, B, H = inputs.shape
    aw = int(attention_width)
    if aw < 1:
        raise ValueError("attention_width must be >= 1")

    passthrough_all = S <= aw

    if passthrough_all:
        TS = S
    else:
        # Largest sequence tile that (a) divides S, (b) is >= aw + 1 so the
        # pass-through prefix and the halo fit in a single tile, and (c) is no
        # bigger than `seq_tile`.  Size `seq_tile` for VMEM: one tile needs
        # roughly 4 * (2*2*TS + TS + aw) * B * H bytes of f32 (double-buffered
        # in/out blocks + halo scratch); keep well under the per-core budget
        # (v5e/v6e: 128 MiB, v7x: 64 MiB).
        TS = S
        for cand in range(min(int(seq_tile), S), aw, -1):
            if S % cand == 0:
                TS = cand
                break

    grid = (S // TS,)
    kernel = functools.partial(
        _attention_kernel, attention_width=aw, passthrough_all=passthrough_all)

    proj_row = weight_proj.reshape(1, H)   # present proj along the lane axis

    return pl.pallas_call(
        kernel,
        out_shape=jax.ShapeDtypeStruct((S, B, H), inputs.dtype),
        grid=grid,
        in_specs=[
            pl.BlockSpec((TS, B, H), lambda t: (t, 0, 0)),
            pl.BlockSpec((H, H), lambda t: (0, 0)),
            pl.BlockSpec((1, H), lambda t: (0, 0)),
        ],
        out_specs=pl.BlockSpec((TS, B, H), lambda t: (t, 0, 0)),
        scratch_shapes=[pltpu.VMEM((TS + aw, B, H), jnp.float32)],
        compiler_params=pltpu.CompilerParams(
            # The halo scratch carries state across sequence tiles, so this grid
            # axis must run sequentially.  The batch axis cannot be split across
            # cores because the original softmax normalizes over batch.
            dimension_semantics=("arbitrary",),
        ),
    )(inputs, weight_W, proj_row)


def reference_forward(inputs, W, proj, attention_width=3):
    """Pure-JAX transcription of the PyTorch forward (for validation)."""
    S = inputs.shape[0]
    outs = []
    for i in range(S):
        if i < attention_width:
            outs.append(inputs[i])
        else:
            vec = inputs[i - attention_width:i]                      # (w, B, H)
            u = jnp.tanh(jnp.einsum('wbh,hk->wbk', vec, W))          # batch_matmul(..., 'tanh')
            a = jnp.einsum('wbh,ho->wbo', u, proj)[..., 0]           # (w, B)
            a = jax.nn.softmax(a, axis=1)                            # nn.Softmax() implicit dim=1
            outs.append(jnp.sum(a[:, :, None] * vec, axis=0))        # weighted sum over window
    return jnp.stack(outs, axis=0)


if __name__ == "__main__":
    S, B, H = 8, 4, 32          # seq=8, batch=4, nhid=32
    attention_width = 3

    key = jax.random.PRNGKey(0)
    k_w, k_p, k_x = jax.random.split(key, 3)
    # nn.Parameter(...).uniform_(-0.1, 0.1)
    weight_W = jax.random.uniform(k_w, (H, H), jnp.float32, -0.1, 0.1)
    weight_proj = jax.random.uniform(k_p, (H, 1), jnp.float32, -0.1, 0.1)
    inputs = jax.random.normal(k_x, (S, B, H), jnp.float32)

    # seq_tile=4 -> grid=(2,) so the multi-tile halo path is exercised at toy size.
    out = attention_layer(inputs, weight_W, weight_proj, attention_width, seq_tile=4)
    out = jax.block_until_ready(out)

    ref = reference_forward(inputs, weight_W, weight_proj, attention_width)
    np.testing.assert_allclose(np.asarray(out), np.asarray(ref), atol=1e-5, rtol=1e-5)

    print("KERNEL_OK")
</pallas_src>

<mosaic_0001>
module attributes {stable_mosaic.version = 11 : i64} {
  func.func @_attention_kernel(%arg0: i32, %arg1: memref<4x4x32xf32, #tpu.memory_space<vmem>>, %arg2: memref<32x32xf32, #tpu.memory_space<vmem>>, %arg3: memref<1x32xf32, #tpu.memory_space<vmem>>, %arg4: memref<4x4x32xf32, #tpu.memory_space<vmem>>, %arg5: memref<7x4x32xf32, #tpu.memory_space<vmem>>) attributes {dimension_semantics = [#tpu.dimension_semantics<arbitrary>], iteration_bounds = array<i64: 2>, scalar_prefetch = 0 : i64, scratch_operands = 1 : i64, tpu.core_type = #tpu.core_type<tc>, window_params = [{transform_indices = @transform_0, window_bounds = array<i64: 4, 4, 32>}, {pipeline_mode = #tpu.pipeline_mode<synchronous>, transform_indices = @transform_1, window_bounds = array<i64: 32, 32>}, {pipeline_mode = #tpu.pipeline_mode<synchronous>, transform_indices = @transform_2, window_bounds = array<i64: 1, 32>}, {transform_indices = @transform_3, window_bounds = array<i64: 4, 4, 32>}]} {
    %c0_i32 = arith.constant 0 : i32
    %0 = arith.cmpi eq, %arg0, %c0_i32 : i32
    %1 = arith.extui %0 : i1 to i32
    %c0_i32_0 = arith.constant 0 : i32
    %2 = arith.cmpi ne, %1, %c0_i32_0 : i32
    scf.if %2 {
      %cst_27 = arith.constant 0.000000e+00 : f32
      %38 = vector.broadcast %cst_27 : f32 to vector<3x4x32xf32>
      %c0_28 = arith.constant 0 : index
      %c0_29 = arith.constant 0 : index
      %c0_30 = arith.constant 0 : index
      %39 = vector.load %arg5[%c0_28, %c0_29, %c0_30] : memref<7x4x32xf32, #tpu.memory_space<vmem>>, vector<3x4x32xf32>
      tpu.vector_store %arg5[%c0_28, %c0_29, %c0_30], %38 {strides = array<i32>} : memref<7x4x32xf32, #tpu.memory_space<vmem>>, vector<3x4x32xf32>,
    } else {
    }
    %c0 = arith.constant 0 : index
    %c0_1 = arith.constant 0 : index
    %c0_2 = arith.constant 0 : index
    %3 = vector.load %arg1[%c0, %c0_1, %c0_2] : memref<4x4x32xf32, #tpu.memory_space<vmem>>, vector<4x4x32xf32>
    %c0_3 = arith.constant 0 : index
    %c0_4 = arith.constant 0 : index
    %4 = vector.load %arg2[%c0_3, %c0_4] : memref<32x32xf32, #tpu.memory_space<vmem>>, vector<32x32xf32>
    %c0_5 = arith.constant 0 : index
    %c0_6 = arith.constant 0 : index
    %5 = vector.load %arg3[%c0_5, %c0_6] : memref<1x32xf32, #tpu.memory_space<vmem>>, vector<1x32xf32>
    %6 = vector.shape_cast %5 : vector<1x32xf32> to vector<1x1x32xf32>
    %7 = vector.shape_cast %3 : vector<4x4x32xf32> to vector<16x32xf32>
    %cst = arith.constant dense<0.000000e+00> : vector<16x32xf32>
    %8 = tpu.matmul %7, %4, %cst {dimension_numbers = #tpu.dot_dimension_numbers<[1], [0], [0], [1], [0, 0, 1, 1], [], []>} : vector<16x32xf32>, vector<32x32xf32>, vector<16x32xf32> -> vector<16x32xf32>
    %9 = math.tanh %8 : vector<16x32xf32>
    %10 = vector.shape_cast %9 : vector<16x32xf32> to vector<4x4x32xf32>
    %11 = vector.broadcast %6 : vector<1x1x32xf32> to vector<4x4x32xf32>
    %12 = arith.mulf %10, %11 : vector<4x4x32xf32>
    %cst_7 = arith.constant dense<0.000000e+00> : vector<4x4xf32>
    %13 = vector.multi_reduction <add>, %12, %cst_7 [2] : vector<4x4x32xf32> to vector<4x4xf32>
    %14 = vector.shape_cast %13 : vector<4x4xf32> to vector<4x4x1xf32>
    %cst_8 = arith.constant dense<0xFF800000> : vector<4x1xf32>
    %15 = vector.multi_reduction <maximumf>, %14, %cst_8 [1] : vector<4x4x1xf32> to vector<4x1xf32>
    %16 = vector.shape_cast %15 : vector<4x1xf32> to vector<4x1x1xf32>
    %17 = vector.broadcast %16 : vector<4x1x1xf32> to vector<4x4x1xf32>
    %18 = arith.subf %14, %17 : vector<4x4x1xf32>
    %19 = math.exp %18 : vector<4x4x1xf32>
    %cst_9 = arith.constant dense<0.000000e+00> : vector<4x1xf32>
    %20 = vector.multi_reduction <add>, %19, %cst_9 [1] : vector<4x4x1xf32> to vector<4x1xf32>
    %21 = vector.shape_cast %20 : vector<4x1xf32> to vector<4x1x1xf32>
    %22 = vector.broadcast %21 : vector<4x1x1xf32> to vector<4x4x1xf32>
    %23 = arith.divf %19, %22 : vector<4x4x1xf32>
    %24 = vector.broadcast %23 : vector<4x4x1xf32> to vector<4x4x32xf32>
    %25 = arith.mulf %24, %3 : vector<4x4x32xf32>
    %c3 = arith.constant 3 : index
    %c0_10 = arith.constant 0 : index
    %c0_11 = arith.constant 0 : index
    %26 = vector.load %arg5[%c3, %c0_10, %c0_11] : memref<7x4x32xf32, #tpu.memory_space<vmem>>, vector<4x4x32xf32>
    tpu.vector_store %arg5[%c3, %c0_10, %c0_11], %25 {strides = array<i32>} : memref<7x4x32xf32, #tpu.memory_space<vmem>>, vector<4x4x32xf32>,
    %c0_12 = arith.constant 0 : index
    %c0_13 = arith.constant 0 : index
    %c0_14 = arith.constant 0 : index
    %27 = vector.load %arg5[%c0_12, %c0_13, %c0_14] : memref<7x4x32xf32, #tpu.memory_space<vmem>>, vector<4x4x32xf32>
    %c1 = arith.constant 1 : index
    %c0_15 = arith.constant 0 : index
    %c0_16 = arith.constant 0 : index
    %28 = vector.load %arg5[%c1, %c0_15, %c0_16] : memref<7x4x32xf32, #tpu.memory_space<vmem>>, vector<4x4x32xf32>
    %29 = arith.addf %27, %28 : vector<4x4x32xf32>
    %c2 = arith.constant 2 : index
    %c0_17 = arith.constant 0 : index
    %c0_18 = arith.constant 0 : index
    %30 = vector.load %arg5[%c2, %c0_17, %c0_18] : memref<7x4x32xf32, #tpu.memory_space<vmem>>, vector<4x4x32xf32>
    %31 = arith.addf %29, %30 : vector<4x4x32xf32>
    %32 = vector.extract_strided_slice %25 {offsets = [1, 0, 0], sizes = [3, 4, 32], strides = [1, 1, 1]} : vector<4x4x32xf32> to vector<3x4x32xf32>
    %c0_19 = arith.constant 0 : index
    %c0_20 = arith.constant 0 : index
    %c0_21 = arith.constant 0 : index
    %33 = vector.load %arg5[%c0_19, %c0_20, %c0_21] : memref<7x4x32xf32, #tpu.memory_space<vmem>>, vector<3x4x32xf32>
    tpu.vector_store %arg5[%c0_19, %c0_20, %c0_21], %32 {strides = array<i32>} : memref<7x4x32xf32, #tpu.memory_space<vmem>>, vector<3x4x32xf32>,
    %c0_22 = arith.constant 0 : index
    %c0_23 = arith.constant 0 : index
    %c0_24 = arith.constant 0 : index
    %34 = vector.load %arg4[%c0_22, %c0_23, %c0_24] : memref<4x4x32xf32, #tpu.memory_space<vmem>>, vector<4x4x32xf32>
    tpu.vector_store %arg4[%c0_22, %c0_23, %c0_24], %31 {strides = array<i32>} : memref<4x4x32xf32, #tpu.memory_space<vmem>>, vector<4x4x32xf32>,
    %c0_i32_25 = arith.constant 0 : i32
    %35 = arith.cmpi eq, %arg0, %c0_i32_25 : i32
    %36 = arith.extui %35 : i1 to i32
    %c0_i32_26 = arith.constant 0 : i32
    %37 = arith.cmpi ne, %36, %c0_i32_26 : i32
    scf.if %37 {
      %38 = vector.extract_strided_slice %3 {offsets = [0, 0, 0], sizes = [3, 4, 32], strides = [1, 1, 1]} : vector<4x4x32xf32> to vector<3x4x32xf32>
      %c0_27 = arith.constant 0 : index
      %c0_28 = arith.constant 0 : index
      %c0_29 = arith.constant 0 : index
      %39 = vector.load %arg4[%c0_27, %c0_28, %c0_29] : memref<4x4x32xf32, #tpu.memory_space<vmem>>, vector<3x4x32xf32>
      tpu.vector_store %arg4[%c0_27, %c0_28, %c0_29], %38 {strides = array<i32>} : memref<4x4x32xf32, #tpu.memory_space<vmem>>, vector<3x4x32xf32>,
    } else {
    }
    return
  }
  func.func @transform_0(%arg0: i32) -> (i32, i32, i32) {
    %c0_i32 = arith.constant 0 : i32
    %c0_i32_0 = arith.constant 0 : i32
    %c0_i32_1 = arith.constant 0 : i32
    return %arg0, %c0_i32, %c0_i32_0 : i32, i32, i32
  }
  func.func @transform_1(%arg0: i32) -> (i32, i32) {
    %c0_i32 = arith.constant 0 : i32
    %c0_i32_0 = arith.constant 0 : i32
    %c0_i32_1 = arith.constant 0 : i32
    return %c0_i32, %c0_i32_0 : i32, i32
  }
  func.func @transform_2(%arg0: i32) -> (i32, i32) {
    %c0_i32 = arith.constant 0 : i32
    %c0_i32_0 = arith.constant 0 : i32
    %c0_i32_1 = arith.constant 0 : i32
    return %c0_i32, %c0_i32_0 : i32, i32
  }
  func.func @transform_3(%arg0: i32) -> (i32, i32, i32) {
    %c0_i32 = arith.constant 0 : i32
    %c0_i32_0 = arith.constant 0 : i32
    %c0_i32_1 = arith.constant 0 : i32
    return %arg0, %c0_i32, %c0_i32_0 : i32, i32, i32
  }
}

</mosaic_0001>

<bundles_post_ra>
// kernel: tpu_custom_call.1
= control target key start
LH: loop header
LB: loop body
LE: loop exit
PB: predicated region body
PF: predicated region fallthrough
CT: control target
= control target key end

     0   :  { %8 = vsyncpa [#allocation4], 0  ;;  %s1115_s0 = inlined_call_operand.hbm [shape: f32[8,4,32], index: 0, kind: input, shape index: {}]   ;;  %s1116_s1 = inlined_call_operand.hbm [shape: f32[32,32], index: 1, kind: input, shape index: {}]   ;;  %s1117_s2 = inlined_call_operand.vmem [shape: f32[1,32], index: 2, kind: input, shape index: {}]   ;;  %s1118_s3 = inlined_call_operand.hbm [shape: f32[8,4,32], index: 3, kind: output, shape index: {}]  }
   0x1   :  { %10 = vsyncpa [#allocation4 + $0x1], 0 }
   0x2   :  { %11 = vsyncpa [#allocation7], 0 }
   0x3   :  { %12 = vsyncpa [#allocation5], 0 }
   0x4   :  { %14 = vsyncpa [#allocation5 + $0x1], 0  ;;  %s852_s12 = smov 0   ;;  %s854_s13 = smov 0  }
   0x5   :  { %s856_s14 = smov 0   ;;  %s858_s15 = smov 0  }
   0x6 LB: > { %s873_s16 = sadd.s32 4294967295, %s820_s15   ;;  %s558_s17 = sadd.s32 4294967294, %s820_s15   ;;  %s820_s15 = sphi %s858_s15, %s1140_s15   ;;  %s816_s14 = sphi %s856_s14, %s1139_s14   ;;  %s812_s13 = sphi %s854_s13, %s1138_s13   ;;  %s808_s12 = sphi %s852_s12, %s1137_s12  }
   0x7   : > { %p40_p0 = scmp.ne.s32.totalorder %s812_s13, %s808_s12  ;;  %p1119_p1 = scmp.eq.s32.totalorder %s873_s16, 0 }
   0x8   : > { %p112_p3 = scmp.eq.s32.totalorder %s558_s17, 1  ;;  %p559_p5 = scmp.ge.s32.totalorder %s820_s15, 1 }
   0x9   : > { %p882_p4 = por %p1119_p1, %p40_p0  ;;  %p119_p7 = scmp.lt.s32.totalorder %s820_s15, 3 }
   0xa   : > { %p887_p6 = por %p112_p3, %p40_p0  ;;  %s822_s21 = smov [#allocation6]  }
   0xb   : > { %s1122_s18 = scalar_select %p882_p4, 1, 0 }
   0xc   : > { %s1123_s19 = scalar_select %p887_p6, 1, 0 }
   0xd   : > { %p893_p9 = pnand %p559_p5, %p119_p7  ;;  %s131_s22 = sshll.u32 %s822_s21, 4  ;;  %s897_s22 = int_to_ptr.vmem [resolvable:$true] %s131_s22 }
   0xe   : > { %s909_s24 = sadd.s32 1, %s820_s15   ;;  %s27_s25 = sadd.s32 1, %s816_s14 }
   0xf   : > { %s1124_s20 = scalar_select %p893_p9, 1, 0 }
  0x10   : > { %p614_p10 = pneg %p893_p9  ;;  %s24_s26 = ssub.s32 %s820_s15, %s909_s24 }
  0x11   : > { %s692_s29 = scalar_lea.hbm %s1116_s1, 512 }
  0x12   : > { %p904_p12 = pnand %p614_p10, %p1119_p1  ;;  %p693_p13 = scmp.ne.s32.totalorder %s1116_s1, %s692_s29 }
  0x13   : > { %p699_p7 = scmp.lt.u32.totalorder %s692_s29, %s1116_s1 }
  0x14   : > { %p694_p0 = pneg %p904_p12 }
  0x16   : > { %p695_p3 = pnand %p694_p0, %p693_p13 }
  0x18   : > { %p696_p5 = pneg %p695_p3 }
  0x1a   : > { %p701_p10 = pnand %p699_p7, %p696_p5 }
  0x1c   : > { %704 = shalt.err (!%p701_p10)
}
  0x1d   : > { %s705_s7 = scalar_lea.vmem %s897_s22, 512  ;;  %p713_p2 = scmp.lt.s32.totalorder %s897_s22, %s897_s22 }
  0x1e   : > { %p706_p11 = scmp.ne.s32.totalorder %s897_s22, %s705_s7  ;;  %p714_p6 = scmp.lt.s32.totalorder %s705_s7, %s705_s7 }
  0x20   : > { %p708_p8 = pnand %p706_p11, %p694_p0  ;;  %p715_p4 = por %p714_p6, %p713_p2 }
  0x22   : > { %p709_p1 = pneg %p708_p8 }
  0x24   : > { %p716_p9 = pnand %p715_p4, %p709_p1 }
  0x26   : > { %719 = shalt.err (!%p716_p9)
}
  0x27   : > { %s823_s8 = smov 128   ;;  %s824_s9 = smov 8  }
  0x28   : > { %617 = dma.hbm_to_vmem [thread:$0]  (!%p904_p12), %s1116_s1, 512, %s897_s22, [#allocation7], %s823_s8, %s823_s8, %s824_s9  }
  0x29   : > { %p25_p2 = scmp.eq.s32.totalorder %s24_s26, 0  ;;  %p34_p1 = scmp.ne.s32.totalorder %s816_s14, %s812_s13 }
  0x2a   : > { %p35_p4 = scmp.eq.s32.totalorder %s820_s15, 0  ;;  %p627_p6 = scmp.lt.s32.totalorder %s820_s15, 2 }
  0x2b   : > { %s940_s17 = scalar_select %p25_p2, %s816_s14, %s27_s25  }
  0x2c   : > { %p36_p8 = por %p35_p4, %p34_p1  ;;  %p1126_p9 = scmp.eq.s32.totalorder %s873_s16, 1 }
  0x2d   : > { %s148_s27 = sand.u32 1, %s816_s14   ;;  %s579_s28 = sshll.u32 %s820_s15, 8 }
  0x2e   : > { %p944_p11 = por %p1126_p9, %p34_p1  ;;  %s562_s29 = sshll.u32 %s148_s27, 4 }
  0x2f   : > { %s953_s4 = scalar_lea.hbm %s1115_s0, %s579_s28  ;;  %s152_s22 = scalar_lea.vmem [#allocation3], %s562_s29 }
  0x30   : > { %s159_s25 = sshll.u32 %s152_s22, 4  ;;  %p955_p12 = pnand %p627_p6, %p36_p8  ;;  %s959_s25 = int_to_ptr.vmem [resolvable:$true] %s159_s25 }
  0x31   : > { %s961_s5 = scalar_lea.sflag [#allocation4], %s148_s27  ;;  %s720_s6 = scalar_lea.hbm %s953_s4, 256 }
  0x32   : > { %p721_p13 = scmp.ne.s32.totalorder %s953_s4, %s720_s6  ;;  %p722_p0 = pneg %p955_p12 }
  0x33   : > { %s725_s9 = scalar_lea.hbm %s1115_s0, 512  ;;  %p726_p7 = scmp.lt.u32.totalorder %s953_s4, %s1115_s0 }
  0x34   : > { %p723_p3 = pnand %p722_p0, %p721_p13  ;;  %p727_p10 = scmp.lt.u32.totalorder %s725_s9, %s720_s6 }
  0x35   : > { %p729_p1 = scmp.lt.u32.totalorder %s720_s6, %s953_s4 }
  0x36   : > { %p724_p5 = pneg %p723_p3  ;;  %p728_p2 = por %p727_p10, %p726_p7 }
  0x38   : > { %p730_p4 = por %p729_p1, %p728_p2 }
  0x3a   : > { %p731_p6 = pnand %p730_p4, %p724_p5 }
  0x3c   : > { %734 = shalt.err (!%p731_p6)
}
  0x3d   : > { %s735_s27 = scalar_lea.vmem %s959_s25, 256  ;;  %s825_s28 = smov [#allocation3]  }
  0x3e   : > { %p736_p8 = scmp.ne.s32.totalorder %s959_s25, %s735_s27  ;;  %s740_s29 = sshll.u32 %s825_s28, 4  ;;  %s741_s29 = int_to_ptr.vmem [resolvable:$false] %s740_s29 }
  0x3f   : > { %s742_s23 = scalar_lea.vmem %s741_s29, 512  ;;  %p743_p3 = scmp.lt.s32.totalorder %s959_s25, %s741_s29 }
  0x40   : > { %p738_p9 = pnand %p736_p8, %p722_p0  ;;  %p744_p7 = scmp.lt.s32.totalorder %s742_s23, %s735_s27 }
  0x42   : > { %p739_p13 = pneg %p738_p9  ;;  %p745_p10 = por %p744_p7, %p743_p3 }
  0x44   : > { %p746_p2 = pnand %p745_p10, %p739_p13 }
  0x46   : > { %749 = shalt.err (!%p746_p2)
}
  0x47   : > { %s826_s30 = smov 64   ;;  %s827_s22 = smov 4  }
  0x48   : > { %621 = dma.hbm_to_vmem [thread:$0]  (!%p955_p12), %s953_s4, 256, %s959_s25, %s961_s5, %s826_s30, %s826_s30, %s827_s22  }
  0x49   : > { %p1129_p0 = scmp.ne.s32.totalorder %s1124_s20, 0 }
  0x4a   : > { %s992_s6 = sand.u32 (!%p1129_p0), 1, %s812_s13   ;;  %p1130_p5 = scmp.ne.s32.totalorder (!%p1129_p0), %s1122_s18, 0 }
  0x4b   : > { %171 = sbr.rel (%p1129_p0) target bundleno = 573 (0x23d), region = 32  ;;  %s566_s7 = sshll.u32 (!%p1129_p0), %s992_s6, 4 }
  0x4c   : > { %s174_s8 = scalar_lea.sflag (!%p1129_p0), [#allocation4], %s992_s6  ;;  %s177_s9 = scalar_lea.vmem (!%p1129_p0), [#allocation3], %s566_s7 }
  0x52   : > { %795 = dma.done.wait (%p1130_p5), %s174_s8, 256  }
  0x53   : > { %797 = vsyncadd (%p1130_p5), %s174_s8, 4294967040  ;;  %p1131_p1 = scmp.eq.s32.totalorder %s873_s16, 0 }
  0x55   : > { %799 = dma.done.wait (%p1131_p1), [#allocation7], 512   ;;  %p1132_p12 = pmov %p1131_p1 }
  0x56   : > { %s1004_s20 = scalar_lea.vmem [#allocation8], %s566_s7  ;;  %p1133_p4 = scmp.ne.s32.totalorder %s873_s16, 0 }
  0x57   : > { %801 = vsyncadd (%p1132_p12), [#allocation7], 4294966784  ;;  %vm210_vm0 = vcmask (!%p1133_p4), 257024   ;;  %v828_v0 = vmov (!%p1133_p4), 0.0  }
  0x58   : > { %209 = sbr.rel (%p1133_p4) target bundleno = 95 (0x5f), region = 44  ;;  %211 = vst.msk [vmem:[#allocation2] sm:$0xf] (!%p1133_p4), %vm210_vm0, %v828_v0  ;;  %212 = vst.msk [vmem:[#allocation2 + $0x4] sm:$0xf] (!%p1133_p4), %vm210_vm0, %v828_v0 }
  0x59   : > { %213 = vst.msk [vmem:[#allocation2 + $0x8] sm:$0xf] (!%p1133_p4), %vm210_vm0, %v828_v0 }
  0x5f PF: > { %v218_v1 = vld [vmem:[#allocation6] sm:$0xff]  ;;  %v219_v2 = vld [vmem:[#allocation6 + $0x8] sm:$0xff]  ;;  %v220_v3 = vld [vmem:[#allocation6 + $0x10] sm:$0xff]  ;;  %vm229_vm1 = vcmask 261120   ;;  %vm327_vm2 = vcmask 257024   ;;  %vm340_vm3 = vcmask 1043456  }
  0x60   : > { %v598_v4 = vpack.c.bf16 %v219_v2, %v218_v1  ;;  %v221_v5 = vld [vmem:[#allocation6 + $0x18] sm:$0xff]  ;;  %v1008_v6 = vld [vmem:[%s177_s9] sm:$0xf]  ;;  %v1010_v7 = vld [vmem:[%s177_s9 + $0x4] sm:$0xf]  ;;  %p1134_p6 = scmp.ne.s32.totalorder %s873_s16, 0 }
  0x61   : > { %v602_v8 = vpack.c.bf16 %v221_v5, %v220_v3  ;;  %v227_v9 = vcombine.low %v1008_v6, %v1010_v7  ;;  %v1014_v10 = vld [vmem:[%s177_s9 + $0x8] sm:$0xf]  ;;  %v1016_v11 = vld [vmem:[%s177_s9 + $0xc] sm:$0xf]  ;;  %v572_v15 = vld [vmem:[%s1117_s2] ss:$0 sm:$0xff] }
  0x62   : > { %599 = vmatprep.subr.bf16.mxu0 %v598_v4  ;;  %v228_v12 = vcombine.low %v1014_v10, %v1016_v11  ;;  %v426_v28 = vld [vmem:[#allocation2] sm:$0xf]  ;;  %v431_v29 = vld [vmem:[#allocation2 + $0x4] sm:$0xf]  ;;  %v440_v31 = vld [vmem:[#allocation2 + $0x8] sm:$0xf] }
  0x63   : > { %601 = vmatpush3.bf16.msra.mxu0 %v598_v4  ;;  %595 = vmatprep.mubr.msk.f32.mxu0 %vm229_vm1, %v227_v9  ;;  %v435_v30 = vadd.f32 %v431_v29, %v426_v28 }
  0x64   : > { %603 = vmatprep.subr.bf16.mxu0 %v602_v8 }
  0x65   : > { %v444_v32 = vadd.f32 %v440_v31, %v435_v30 }
  0x67   : > { %605 = vmatpush3.bf16.msra.mxu0 %v602_v8  ;;  %451 = vst.msk [vmem:[%s1004_s20] sm:$0xf] %vm327_vm2, %v444_v32 }
  0x68   : > { %458 = vst.msk [vmem:[%s1004_s20] sm:$0xf] (!%p1134_p6), %vm327_vm2, %v1008_v6 }
  0x6a   : > { %596 = vmatmul.mubr.msk.f32.vlgmr.msra.gmra.mrb[0].mxu0 %vm229_vm1, %v228_v12 }
 0x13d   : > { %v597_v13 = vpop.f32.mrb[0].mxu0 }
 0x13e   : > { %672 = vtanh.f32 %v597_v13  ;;  %v300_v14 = vpop.f32.mrb[1].mxu0 }
 0x13f   : > { %674 = vtanh.f32 %v300_v14 }
 0x148   : > { %v673_v16 = vpop.eup %672 }
 0x149   : > { %v675_v17 = vpop.eup %674  ;;  %v325_v18 = vmul.f32 %v673_v16, %v572_v15  ;;  %v314_v19 = vcombine.high %v673_v16, %v673_v16 }
 0x14a   : > { %v323_v20 = vmul.f32 %v675_v17, %v572_v15  ;;  %v313_v21 = vcombine.high %v675_v17, %v675_v17 }
 0x14b   : > { %v334_v22 = vsel %vm327_vm2, %v325_v18, 0.0  ;;  %v326_v23 = vmul.f32 %v572_v15, %v314_v19 }
 0x14c   : > { %335 = vadd.xlane.f32.xlu1 %v334_v22  ;;  %v328_v24 = vsel %vm327_vm2, %v323_v20, 0.0  ;;  %v324_v25 = vmul.f32 %v572_v15, %v313_v21 }
 0x14d   : > { %329 = vadd.xlane.f32.xlu0 %v328_v24  ;;  %v337_v26 = vsel %vm327_vm2, %v326_v23, 0.0 }
 0x14e   : > { %v331_v27 = vsel %vm327_vm2, %v324_v25, 0.0 }
 0x150   : > { %338 = vadd.xlane.f32.xlu1 %v337_v26 }
 0x151   : > { %332 = vadd.xlane.f32.xlu0 %v331_v27 }
 0x1d9   : > { %v336_v33 = vpop.xlane.xlu1 %335 }
 0x1da   : > { %v355_v34 = vsel %vm340_vm3, %v336_v33, -inf  ;;  %v330_v35 = vpop.xlane.xlu0 %329 }
 0x1db   : > { %v356_v36 = vrot.slane %v355_v34, 4  ;;  %v341_v37 = vsel %vm340_vm3, %v330_v35, -inf }
 0x1dc   : > { %v342_v38 = vrot.slane %v341_v37, 4 }
 0x1dd   : > { %v357_v39 = vmax.f32 %v355_v34, %v356_v36  ;;  %v339_v40 = vpop.xlane.xlu1 %338 }
 0x1de   : > { %v343_v41 = vmax.f32 %v341_v37, %v342_v38  ;;  %v362_v42 = vsel %vm340_vm3, %v339_v40, -inf  ;;  %v333_v43 = vpop.xlane.xlu0 %332 }
 0x1df   : > { %v358_v44 = vrot.slane %v357_v39, 2  ;;  %v363_v45 = vrot.slane %v362_v42, 4  ;;  %v348_v46 = vsel %vm340_vm3, %v333_v43, -inf }
 0x1e0   : > { %v344_v47 = vrot.slane %v343_v41, 2  ;;  %v349_v48 = vrot.slane %v348_v46, 4 }
 0x1e1   : > { %v359_v49 = vmax.f32 %v357_v39, %v358_v44  ;;  %v364_v50 = vmax.f32 %v362_v42, %v363_v45 }
 0x1e2   : > { %v345_v51 = vmax.f32 %v343_v41, %v344_v47  ;;  %v350_v52 = vmax.f32 %v348_v46, %v349_v48 }
 0x1e3   : > { %v360_v53 = vrot.slane %v359_v49, 1  ;;  %v365_v54 = vrot.slane %v364_v50, 2 }
 0x1e4   : > { %v346_v55 = vrot.slane %v345_v51, 1  ;;  %v351_v56 = vrot.slane %v350_v52, 2 }
 0x1e5   : > { %v361_v57 = vmax.f32 %v359_v49, %v360_v53  ;;  %v366_v58 = vmax.f32 %v364_v50, %v365_v54  ;;  %v427_v49 = vld [vmem:[#allocation2 + $0x4] sm:$0xf] }
 0x1e6   : > { %v347_v59 = vmax.f32 %v345_v51, %v346_v55  ;;  %v352_v60 = vmax.f32 %v350_v52, %v351_v56  ;;  %v428_v55 = vld [vmem:[#allocation2 + $0x8] sm:$0xf] }
 0x1e7   : > { %v371_v61 = vsub.f32 %v336_v33, %v361_v57  ;;  %v367_v62 = vrot.slane %v366_v58, 1  ;;  %v432_v56 = vld [vmem:[#allocation2 + $0x8] sm:$0xf] }
 0x1e8   : > { %v369_v63 = vsub.f32 %v330_v35, %v347_v59  ;;  %v353_v0 = vrot.slane %v352_v60, 1 }
 0x1e9   : > { %v377_v1 = vmul.f32 1.442695, %v371_v61  ;;  %v368_v2 = vmax.f32 %v366_v58, %v367_v62 }
 0x1ea   : > { %v373_v3 = vmul.f32 1.442695, %v369_v63  ;;  %v354_v4 = vmax.f32 %v352_v60, %v353_v0  ;;  %v436_v60 = vadd.f32 %v432_v56, %v427_v49 }
 0x1eb   : > { %676 = vpow2.f32 %v377_v1  ;;  %v372_v5 = vsub.f32 %v339_v40, %v368_v2 }
 0x1ec   : > { %678 = vpow2.f32 %v373_v3  ;;  %v370_v8 = vsub.f32 %v333_v43, %v354_v4 }
 0x1ed   : > { %v379_v9 = vmul.f32 1.442695, %v372_v5 }
 0x1ee   : > { %v375_v12 = vmul.f32 1.442695, %v370_v8 }
 0x1ef   : > { %680 = vpow2.f32 %v379_v9 }
 0x1f0   : > { %682 = vpow2.f32 %v375_v12 }
 0x1f5   : > { %v677_v13 = vpop.eup %676 }
 0x1f6   : > { %v679_v14 = vpop.eup %678  ;;  %v395_v15 = vsel %vm340_vm3, %v677_v13, 0.0 }
 0x1f7   : > { %v396_v16 = vrot.slane %v395_v15, 4  ;;  %v381_v17 = vsel %vm340_vm3, %v679_v14, 0.0 }
 0x1f8   : > { %v382_v18 = vrot.slane %v381_v17, 4 }
 0x1f9   : > { %v681_v19 = vpop.eup %680  ;;  %v397_v20 = vadd.f32 %v396_v16, %v395_v15 }
 0x1fa   : > { %v683_v21 = vpop.eup %682  ;;  %v383_v22 = vadd.f32 %v382_v18, %v381_v17  ;;  %v402_v23 = vsel %vm340_vm3, %v681_v19, 0.0 }
 0x1fb   : > { %v398_v24 = vrot.slane %v397_v20, 2  ;;  %v403_v25 = vrot.slane %v402_v23, 4  ;;  %v388_v26 = vsel %vm340_vm3, %v683_v21, 0.0 }
 0x1fc   : > { %v384_v27 = vrot.slane %v383_v22, 2  ;;  %v389_v28 = vrot.slane %v388_v26, 4 }
 0x1fd   : > { %v399_v29 = vadd.f32 %v398_v24, %v397_v20  ;;  %v404_v30 = vadd.f32 %v403_v25, %v402_v23 }
 0x1fe   : > { %v385_v31 = vadd.f32 %v384_v27, %v383_v22  ;;  %v390_v32 = vadd.f32 %v389_v28, %v388_v26 }
 0x1ff   : > { %v400_v33 = vrot.slane %v399_v29, 1  ;;  %v405_v34 = vrot.slane %v404_v30, 2 }
 0x200   : > { %v386_v35 = vrot.slane %v385_v31, 1  ;;  %v391_v36 = vrot.slane %v390_v32, 2 }
 0x201   : > { %v401_v37 = vadd.f32 %v400_v33, %v399_v29  ;;  %v406_v38 = vadd.f32 %v405_v34, %v404_v30 }
 0x202   : > { %v387_v39 = vadd.f32 %v386_v35, %v385_v31  ;;  %v392_v40 = vadd.f32 %v391_v36, %v390_v32 }
 0x203   : > { %684 = vrcp.f32 %v401_v37  ;;  %v407_v41 = vrot.slane %v406_v38, 1 }
 0x204   : > { %686 = vrcp.f32 %v387_v39  ;;  %v393_v42 = vrot.slane %v392_v40, 1 }
 0x205   : > { %v408_v43 = vadd.f32 %v407_v41, %v406_v38 }
 0x206   : > { %v394_v44 = vadd.f32 %v393_v42, %v392_v40 }
 0x207   : > { %688 = vrcp.f32 %v408_v43 }
 0x208   : > { %690 = vrcp.f32 %v394_v44 }
 0x20d   : > { %v685_v45 = vpop.eup %684 }
 0x20e   : > { %v687_v46 = vpop.eup %686  ;;  %v414_v47 = vmul.f32 %v685_v45, %v677_v13 }
 0x20f   : > { %v410_v48 = vmul.f32 %v687_v46, %v679_v14 }
 0x210   : > { %v419_v50 = vmul.f32 %v414_v47, %v1014_v10 }
 0x211   : > { %v689_v51 = vpop.eup %688  ;;  %v417_v52 = vmul.f32 %v410_v48, %v1008_v6 }
 0x212   : > { %v691_v53 = vpop.eup %690  ;;  %424 = vst.msk [vmem:[#allocation2 + $0x14] sm:$0xf] %vm327_vm2, %v419_v50  ;;  %v416_v54 = vmul.f32 %v689_v51, %v681_v19  ;;  %449 = vst.msk [vmem:[#allocation2 + $0x4] sm:$0xf] %vm327_vm2, %v419_v50 }
 0x213   : > { %422 = vst.msk [vmem:[#allocation2 + $0xc] sm:$0xf] %vm327_vm2, %v417_v52  ;;  %v412_v57 = vmul.f32 %v691_v53, %v683_v21 }
 0x214   : > { %v420_v58 = vmul.f32 %v416_v54, %v1016_v11 }
 0x215   : > { %v418_v59 = vmul.f32 %v412_v57, %v1010_v7 }
 0x216   : > { %450 = vst.msk [vmem:[#allocation2 + $0x8] sm:$0xf] %vm327_vm2, %v420_v58 }
 0x217   : > { %423 = vst.msk [vmem:[#allocation2 + $0x10] sm:$0xf] %vm327_vm2, %v418_v59  ;;  %448 = vst.msk [vmem:[#allocation2] sm:$0xf] %vm327_vm2, %v418_v59 }
 0x219   : > { %v443_v5 = vld [vmem:[#allocation2 + $0x14] sm:$0xf] }
 0x21a   : > { %v433_v61 = vld [vmem:[#allocation2 + $0xc] sm:$0xf] }
 0x21b   : > { %v441_v62 = vld [vmem:[#allocation2 + $0xc] sm:$0xf]  ;;  %v437_v0 = vadd.f32 %v433_v61, %v428_v55 }
 0x21c   : > { %v445_v63 = vadd.f32 %v441_v62, %v436_v60  ;;  %v429_v1 = vld [vmem:[#allocation2 + $0xc] sm:$0xf] }
 0x21d   : > { %457 = sbr.rel (%p1134_p6) target bundleno = 548 (0x224), region = 48 }
 0x21e   : > { %452 = vst.msk [vmem:[%s1004_s20 + $0x4] sm:$0xf] %vm327_vm2, %v445_v63  ;;  %v434_v2 = vld [vmem:[#allocation2 + $0x10] sm:$0xf] }
 0x21f   : > { %v442_v11 = vld [vmem:[#allocation2 + $0x10] sm:$0xf]  ;;  %v438_v3 = vadd.f32 %v434_v2, %v429_v1  ;;  %459 = vst.msk [vmem:[%s1004_s20 + $0x4] sm:$0xf] (!%p1134_p6), %vm327_vm2, %v1010_v7 }
 0x220   : > { %v446_v4 = vadd.f32 %v442_v11, %v437_v0 }
 0x221   : > { %v447_v8 = vadd.f32 %v443_v5, %v438_v3 }
 0x222   : > { %453 = vst.msk [vmem:[%s1004_s20 + $0x8] sm:$0xf] %vm327_vm2, %v446_v4 }
 0x223   : > { %454 = vst.msk [vmem:[%s1004_s20 + $0xc] sm:$0xf] %vm327_vm2, %v447_v8  ;;  %460 = vst.msk [vmem:[%s1004_s20 + $0x8] sm:$0xf] (!%p1134_p6), %vm327_vm2, %v1014_v10 }
 0x224 PF: > { %s580_s25 = sshll.u32 %s873_s16, 8  ;;  %s475_s11 = sshll.u32 %s1004_s20, 4  ;;  %s1071_s11 = int_to_ptr.vmem [resolvable:$true] %s475_s11 }
 0x225   : > { %s1068_s10 = scalar_lea.hbm %s1118_s3, %s580_s25  ;;  %s462_s27 = scalar_lea.sflag [#allocation5], %s992_s6 }
 0x226   : > { %s750_s28 = scalar_lea.vmem %s1071_s11, 256  ;;  %s829_s29 = smov [#allocation8]  }
 0x227   : > { %p751_p8 = scmp.ne.s32.totalorder %s1071_s11, %s750_s28  ;;  %s754_s23 = sshll.u32 %s829_s29, 4  ;;  %s755_s23 = int_to_ptr.vmem [resolvable:$false] %s754_s23 }
 0x228   : > { %s756_s16 = scalar_lea.vmem %s755_s23, 512  ;;  %p757_p3 = scmp.lt.s32.totalorder %s1071_s11, %s755_s23 }
 0x229   : > { %p752_p9 = pnand %p751_p8, %p944_p11  ;;  %p758_p7 = scmp.lt.s32.totalorder %s756_s16, %s750_s28 }
 0x22b   : > { %p753_p13 = pneg %p752_p9  ;;  %p759_p10 = por %p758_p7, %p757_p3 }
 0x22d   : > { %p760_p2 = pnand %p759_p10, %p753_p13 }
 0x22f   : > { %763 = shalt.err (!%p760_p2)
}
 0x230   : > { %s764_s30 = scalar_lea.hbm %s1068_s10, 256  ;;  %s768_s8 = scalar_lea.hbm %s1118_s3, 512 }
 0x231   : > { %p765_p0 = scmp.ne.s32.totalorder %s1068_s10, %s764_s30  ;;  %p769_p12 = scmp.lt.u32.totalorder %s1068_s10, %s1118_s3 }
 0x232   : > { %p770_p4 = scmp.lt.u32.totalorder %s768_s8, %s764_s30  ;;  %p772_p8 = scmp.lt.u32.totalorder %s764_s30, %s1068_s10 }
 0x233   : > { %p766_p5 = pnand %p765_p0, %p944_p11 }
 0x234   : > { %p771_p6 = por %p770_p4, %p769_p12 }
 0x235   : > { %p767_p1 = pneg %p766_p5 }
 0x236   : > { %p773_p9 = por %p772_p8, %p771_p6 }
 0x238   : > { %p774_p13 = pnand %p773_p9, %p767_p1 }
 0x23a   : > { %777 = shalt.err (!%p774_p13)
}
 0x23b   : > { %s830_s18 = smov 64   ;;  %s831_s4 = smov 4  }
 0x23c   : > { %612 = dma.vmem_to_hbm [thread:$0]  (%p944_p11), %s1071_s11, 256, %s1068_s10, %s462_s27, %s830_s18, %s830_s18, %s831_s4  }
 0x23d PF: > { %s490_s25 = sand.u32 1, %s808_s12   ;;  %p1135_p3 = scmp.ne.s32.totalorder %s1123_s19, 0 }
 0x23e   : > { %p1136_p7 = scmp.ge.s32.totalorder %s820_s15, 2  ;;  %s491_s26 = scalar_lea.sflag [#allocation5], %s490_s25 }
 0x240   : > { %p623_p10 = pnand %p1136_p7, %p1135_p3 }
 0x242   : > { %803 = dma.done.wait (!%p623_p10), %s491_s26, 256  }
 0x243   : > { %805 = vsyncadd (!%p623_p10), %s491_s26, 4294967040  ;;  %p17_p2 = scmp.ge.s32.totalorder %s909_s24, 4   ;;  %s1137_s12 = smov %s812_s13 }
 0x244   : > { %s1138_s13 = smov %s816_s14  ;;  %s1139_s14 = smov %s940_s17 }
 0x245   : > { %s1140_s15 = smov %s909_s24  ;;  %19 = sbr.rel (!%p17_p2) target bundleno = 6 (0x6), region = 92 }
 0x24c   :  { %496 = vsyncpa [#allocation4], 1 }
 0x24d   :  { %498 = vsyncpa [#allocation4 + $0x1], 1 }
 0x24e   :  { %499 = vsyncpa [#allocation7], 1 }
 0x24f   :  { %500 = vsyncpa [#allocation5], 1 }
 0x250   :  { %502 = vsyncpa [#allocation5 + $0x1], 1 }

</bundles_post_ra>
